<compile_context>
chip_gen: v5e
topology: v5e:2x2
jax: 0.10.0
libtpu: 0.0.40
codegen_flags: <defaults>
</compile_context>

<pallas_src>
import functools

import jax
import jax.numpy as jnp
from jax.experimental import pallas as pl
from jax.experimental.pallas import tpu as pltpu


def _local_mean_kernel(x_ref, o_ref, vp_ref, hp_ref, *,
                       patch_size: int, pad: int, out_h: int, out_w: int):
    # x_ref : (nb, H, W)            un-padded image planes (input dtype)
    # o_ref : (nb, out_h, out_w)    local means (input dtype)
    # vp_ref: (nb, H + 2*pad, W)    f32 scratch: vertically reflect-padded planes
    # hp_ref: (nb, out_h, W + 2*pad) f32 scratch: horizontally reflect-padded row sums
    nb, H, W = x_ref.shape
    x = x_ref[...].astype(jnp.float32)

    # ---- build vertical reflect halo in VMEM (sublane direction, cheap row stores) ----
    vp_ref[:, pad:pad + H, :] = x
    for p in range(pad):
        # padded row p           <- original row (pad - p)
        vp_ref[:, p:p + 1, :] = x[:, pad - p:pad - p + 1, :]
        # padded row pad + H + p <- original row (H - 2 - p)
        vp_ref[:, pad + H + p:pad + H + p + 1, :] = x[:, H - 2 - p:H - 1 - p, :]

    # ---- vertical pass: patch aligned sublane-shifted slices ----
    vsum = vp_ref[:, 0:out_h, :]
    for dy in range(1, patch_size):
        vsum = vsum + vp_ref[:, dy:dy + out_h, :]

    # ---- build horizontal reflect halo in VMEM (lane direction) ----
    hp_ref[:, :, pad:pad + W] = vsum
    for p in range(pad):
        hp_ref[:, :, p:p + 1] = vsum[:, :, pad - p:pad - p + 1]
        hp_ref[:, :, pad + W + p:pad + W + p + 1] = vsum[:, :, W - 2 - p:W - 1 - p]

    # ---- horizontal pass: patch lane-shifted slices of the row sums ----
    hsum = hp_ref[:, :, 0:out_w]
    for dx in range(1, patch_size):
        hsum = hsum + hp_ref[:, :, dx:dx + out_w]

    o_ref[...] = (hsum * (1.0 / float(patch_size * patch_size))).astype(o_ref.dtype)


def image_local_mean(image: jax.Array, patch_size: int = 5) -> jax.Array:
    """Local mean of an image with a sliding window and reflect padding.

    Args:
        image: [B, C, H, W] array.
        patch_size: window size (default 5).
    Returns:
        [B, C, H + 2*(patch//2) - patch + 1, W + ...] array (== [B, C, H, W]
        for odd patch sizes), same dtype as `image`.
    """
    B, C, H, W = image.shape
    pad = patch_size // 2
    if pad >= H or pad >= W:
        raise ValueError(
            f"Reflect padding requires H, W > patch_size//2; got H={H}, W={W}, pad={pad}.")
    out_h = H + 2 * pad - patch_size + 1   # == H for odd patch_size
    out_w = W + 2 * pad - patch_size + 1

    N = B * C
    x = image.reshape(N, H, W)             # free reshape on contiguous NCHW

    # Planes per grid step: the largest divisor of N whose f32 plane block stays
    # under ~1 MiB (kernel scratch/temps are a small multiple of this), so small
    # images get big blocks (few grid steps) while large planes fall back to 1.
    plane_bytes = max(H * W * 4, 1)
    nb_cap = max(1, (1 << 20) // plane_bytes)
    nb = 1
    for d in range(1, N + 1):
        if N % d == 0 and d <= nb_cap:
            nb = d

    kernel = functools.partial(
        _local_mean_kernel, patch_size=patch_size, pad=pad, out_h=out_h, out_w=out_w)

    out = pl.pallas_call(
        kernel,
        out_shape=jax.ShapeDtypeStruct((N, out_h, out_w), image.dtype),
        grid_spec=pltpu.PrefetchScalarGridSpec(
            num_scalar_prefetch=0,
            grid=(N // nb,),
            in_specs=[
                # Last two dims equal the full array dims, so the (8,128)
                # divisibility constraint does not apply.
                pl.BlockSpec((nb, H, W), lambda i: (i, 0, 0)),
            ],
            out_specs=pl.BlockSpec((nb, out_h, out_w), lambda i: (i, 0, 0)),
            scratch_shapes=[
                pltpu.VMEM((nb, H + 2 * pad, W), jnp.float32),        # vp
                pltpu.VMEM((nb, out_h, W + 2 * pad), jnp.float32),    # hp (row sums)
            ],
        ),
        compiler_params=pltpu.CompilerParams(
            dimension_semantics=("parallel",),
            vmem_limit_bytes=48 * 1024 * 1024,
        ),
    )(x)
    return out.reshape(B, C, out_h, out_w)


class ImageLocalMean:
    """JAX/Pallas equivalent of the PyTorch ImageLocalMean module."""

    def __init__(self, patch_size: int = 5):
        self.patch_size = patch_size

    def __call__(self, image: jax.Array) -> jax.Array:
        return image_local_mean(image, self.patch_size)


def _reference_local_mean(image: jax.Array, patch_size: int = 5) -> jax.Array:
    """Pure-JAX reference (mirrors the PyTorch pad + unfold + mean semantics)."""
    B, C, H, W = image.shape
    pad = patch_size // 2
    padded = jnp.pad(image, ((0, 0), (0, 0), (pad, pad), (pad, pad)), mode="reflect")
    out_h = H + 2 * pad - patch_size + 1
    out_w = W + 2 * pad - patch_size + 1
    acc = jnp.zeros((B, C, out_h, out_w), dtype=jnp.float32)
    for dy in range(patch_size):
        for dx in range(patch_size):
            acc = acc + padded[:, :, dy:dy + out_h, dx:dx + out_w].astype(jnp.float32)
    return (acc / (patch_size * patch_size)).astype(image.dtype)


if __name__ == "__main__":
    key = jax.random.PRNGKey(0)

    # Primary test: shapes implied by the module defaults.
    B, C, H, W = 2, 4, 16, 16
    x = jax.random.uniform(key, (B, C, H, W), dtype=jnp.float32)
    module = ImageLocalMean(patch_size=5)
    out = jax.block_until_ready(module(x))
    ref = _reference_local_mean(x, 5)
    assert out.shape == ref.shape, (out.shape, ref.shape)
    assert out.dtype == x.dtype, out.dtype
    assert jnp.allclose(out, ref, atol=1e-5, rtol=1e-5), float(jnp.max(jnp.abs(out - ref)))

    # Secondary sanity check: non-square spatial dims, different patch size.
    x2 = jax.random.uniform(jax.random.PRNGKey(0), (1, 3, 24, 40), dtype=jnp.float32)
    out2 = jax.block_until_ready(image_local_mean(x2, patch_size=3))
    ref2 = _reference_local_mean(x2, 3)
    assert out2.shape == ref2.shape, (out2.shape, ref2.shape)
    assert jnp.allclose(out2, ref2, atol=1e-5, rtol=1e-5), float(jnp.max(jnp.abs(out2 - ref2)))

    print("KERNEL_OK")
</pallas_src>

<mosaic_0001>
module attributes {stable_mosaic.version = 11 : i64} {
  func.func @_local_mean_kernel(%arg0: i32, %arg1: memref<8x16x16xf32, #tpu.memory_space<vmem>>, %arg2: memref<8x16x16xf32, #tpu.memory_space<vmem>>, %arg3: memref<8x20x16xf32, #tpu.memory_space<vmem>>, %arg4: memref<8x16x20xf32, #tpu.memory_space<vmem>>) attributes {dimension_semantics = [#tpu.dimension_semantics<parallel>], iteration_bounds = array<i64: 1>, scalar_prefetch = 0 : i64, scratch_operands = 2 : i64, tpu.core_type = #tpu.core_type<tc>, window_params = [{transform_indices = @transform_0, window_bounds = array<i64: 8, 16, 16>}, {transform_indices = @transform_1, window_bounds = array<i64: 8, 16, 16>}]} {
    %c0 = arith.constant 0 : index
    %c0_0 = arith.constant 0 : index
    %c0_1 = arith.constant 0 : index
    %0 = vector.load %arg1[%c0, %c0_0, %c0_1] : memref<8x16x16xf32, #tpu.memory_space<vmem>>, vector<8x16x16xf32>
    %c0_2 = arith.constant 0 : index
    %c2 = arith.constant 2 : index
    %c0_3 = arith.constant 0 : index
    %1 = vector.load %arg3[%c0_2, %c2, %c0_3] : memref<8x20x16xf32, #tpu.memory_space<vmem>>, vector<8x16x16xf32>
    tpu.vector_store %arg3[%c0_2, %c2, %c0_3], %0 {strides = array<i32>} : memref<8x20x16xf32, #tpu.memory_space<vmem>>, vector<8x16x16xf32>,
    %2 = vector.extract_strided_slice %0 {offsets = [0, 2, 0], sizes = [8, 1, 16], strides = [1, 1, 1]} : vector<8x16x16xf32> to vector<8x1x16xf32>
    %c0_4 = arith.constant 0 : index
    %c0_5 = arith.constant 0 : index
    %c0_6 = arith.constant 0 : index
    %3 = vector.load %arg3[%c0_4, %c0_5, %c0_6] : memref<8x20x16xf32, #tpu.memory_space<vmem>>, vector<8x1x16xf32>
    tpu.vector_store %arg3[%c0_4, %c0_5, %c0_6], %2 {strides = array<i32>} : memref<8x20x16xf32, #tpu.memory_space<vmem>>, vector<8x1x16xf32>,
    %4 = vector.extract_strided_slice %0 {offsets = [0, 14, 0], sizes = [8, 1, 16], strides = [1, 1, 1]} : vector<8x16x16xf32> to vector<8x1x16xf32>
    %c0_7 = arith.constant 0 : index
    %c18 = arith.constant 18 : index
    %c0_8 = arith.constant 0 : index
    %5 = vector.load %arg3[%c0_7, %c18, %c0_8] : memref<8x20x16xf32, #tpu.memory_space<vmem>>, vector<8x1x16xf32>
    tpu.vector_store %arg3[%c0_7, %c18, %c0_8], %4 {strides = array<i32>} : memref<8x20x16xf32, #tpu.memory_space<vmem>>, vector<8x1x16xf32>,
    %6 = vector.extract_strided_slice %0 {offsets = [0, 1, 0], sizes = [8, 1, 16], strides = [1, 1, 1]} : vector<8x16x16xf32> to vector<8x1x16xf32>
    %c0_9 = arith.constant 0 : index
    %c1 = arith.constant 1 : index
    %c0_10 = arith.constant 0 : index
    %7 = vector.load %arg3[%c0_9, %c1, %c0_10] : memref<8x20x16xf32, #tpu.memory_space<vmem>>, vector<8x1x16xf32>
    tpu.vector_store %arg3[%c0_9, %c1, %c0_10], %6 {strides = array<i32>} : memref<8x20x16xf32, #tpu.memory_space<vmem>>, vector<8x1x16xf32>,
    %8 = vector.extract_strided_slice %0 {offsets = [0, 13, 0], sizes = [8, 1, 16], strides = [1, 1, 1]} : vector<8x16x16xf32> to vector<8x1x16xf32>
    %c0_11 = arith.constant 0 : index
    %c19 = arith.constant 19 : index
    %c0_12 = arith.constant 0 : index
    %9 = vector.load %arg3[%c0_11, %c19, %c0_12] : memref<8x20x16xf32, #tpu.memory_space<vmem>>, vector<8x1x16xf32>
    tpu.vector_store %arg3[%c0_11, %c19, %c0_12], %8 {strides = array<i32>} : memref<8x20x16xf32, #tpu.memory_space<vmem>>, vector<8x1x16xf32>,
    %c0_13 = arith.constant 0 : index
    %c0_14 = arith.constant 0 : index
    %c0_15 = arith.constant 0 : index
    %10 = vector.load %arg3[%c0_13, %c0_14, %c0_15] : memref<8x20x16xf32, #tpu.memory_space<vmem>>, vector<8x16x16xf32>
    %c0_16 = arith.constant 0 : index
    %c1_17 = arith.constant 1 : index
    %c0_18 = arith.constant 0 : index
    %11 = vector.load %arg3[%c0_16, %c1_17, %c0_18] : memref<8x20x16xf32, #tpu.memory_space<vmem>>, vector<8x16x16xf32>
    %12 = arith.addf %10, %11 : vector<8x16x16xf32>
    %c0_19 = arith.constant 0 : index
    %c2_20 = arith.constant 2 : index
    %c0_21 = arith.constant 0 : index
    %13 = vector.load %arg3[%c0_19, %c2_20, %c0_21] : memref<8x20x16xf32, #tpu.memory_space<vmem>>, vector<8x16x16xf32>
    %14 = arith.addf %12, %13 : vector<8x16x16xf32>
    %c0_22 = arith.constant 0 : index
    %c3 = arith.constant 3 : index
    %c0_23 = arith.constant 0 : index
    %15 = vector.load %arg3[%c0_22, %c3, %c0_23] : memref<8x20x16xf32, #tpu.memory_space<vmem>>, vector<8x16x16xf32>
    %16 = arith.addf %14, %15 : vector<8x16x16xf32>
    %c0_24 = arith.constant 0 : index
    %c4 = arith.constant 4 : index
    %c0_25 = arith.constant 0 : index
    %17 = vector.load %arg3[%c0_24, %c4, %c0_25] : memref<8x20x16xf32, #tpu.memory_space<vmem>>, vector<8x16x16xf32>
    %18 = arith.addf %16, %17 : vector<8x16x16xf32>
    %c0_26 = arith.constant 0 : index
    %c0_27 = arith.constant 0 : index
    %c2_28 = arith.constant 2 : index
    %19 = vector.load %arg4[%c0_26, %c0_27, %c2_28] : memref<8x16x20xf32, #tpu.memory_space<vmem>>, vector<8x16x16xf32>
    tpu.vector_store %arg4[%c0_26, %c0_27, %c2_28], %18 {strides = array<i32>} : memref<8x16x20xf32, #tpu.memory_space<vmem>>, vector<8x16x16xf32>,
    %20 = vector.extract_strided_slice %18 {offsets = [0, 0, 2], sizes = [8, 16, 1], strides = [1, 1, 1]} : vector<8x16x16xf32> to vector<8x16x1xf32>
    %c0_29 = arith.constant 0 : index
    %c0_30 = arith.constant 0 : index
    %c0_31 = arith.constant 0 : index
    %21 = vector.load %arg4[%c0_29, %c0_30, %c0_31] : memref<8x16x20xf32, #tpu.memory_space<vmem>>, vector<8x16x1xf32>
    tpu.vector_store %arg4[%c0_29, %c0_30, %c0_31], %20 {strides = array<i32>} : memref<8x16x20xf32, #tpu.memory_space<vmem>>, vector<8x16x1xf32>,
    %22 = vector.extract_strided_slice %18 {offsets = [0, 0, 14], sizes = [8, 16, 1], strides = [1, 1, 1]} : vector<8x16x16xf32> to vector<8x16x1xf32>
    %c0_32 = arith.constant 0 : index
    %c0_33 = arith.constant 0 : index
    %c18_34 = arith.constant 18 : index
    %23 = vector.load %arg4[%c0_32, %c0_33, %c18_34] : memref<8x16x20xf32, #tpu.memory_space<vmem>>, vector<8x16x1xf32>
    tpu.vector_store %arg4[%c0_32, %c0_33, %c18_34], %22 {strides = array<i32>} : memref<8x16x20xf32, #tpu.memory_space<vmem>>, vector<8x16x1xf32>,
    %24 = vector.extract_strided_slice %18 {offsets = [0, 0, 1], sizes = [8, 16, 1], strides = [1, 1, 1]} : vector<8x16x16xf32> to vector<8x16x1xf32>
    %c0_35 = arith.constant 0 : index
    %c0_36 = arith.constant 0 : index
    %c1_37 = arith.constant 1 : index
    %25 = vector.load %arg4[%c0_35, %c0_36, %c1_37] : memref<8x16x20xf32, #tpu.memory_space<vmem>>, vector<8x16x1xf32>
    tpu.vector_store %arg4[%c0_35, %c0_36, %c1_37], %24 {strides = array<i32>} : memref<8x16x20xf32, #tpu.memory_space<vmem>>, vector<8x16x1xf32>,
    %26 = vector.extract_strided_slice %18 {offsets = [0, 0, 13], sizes = [8, 16, 1], strides = [1, 1, 1]} : vector<8x16x16xf32> to vector<8x16x1xf32>
    %c0_38 = arith.constant 0 : index
    %c0_39 = arith.constant 0 : index
    %c19_40 = arith.constant 19 : index
    %27 = vector.load %arg4[%c0_38, %c0_39, %c19_40] : memref<8x16x20xf32, #tpu.memory_space<vmem>>, vector<8x16x1xf32>
    tpu.vector_store %arg4[%c0_38, %c0_39, %c19_40], %26 {strides = array<i32>} : memref<8x16x20xf32, #tpu.memory_space<vmem>>, vector<8x16x1xf32>,
    %c0_41 = arith.constant 0 : index
    %c0_42 = arith.constant 0 : index
    %c0_43 = arith.constant 0 : index
    %28 = vector.load %arg4[%c0_41, %c0_42, %c0_43] : memref<8x16x20xf32, #tpu.memory_space<vmem>>, vector<8x16x16xf32>
    %c0_44 = arith.constant 0 : index
    %c0_45 = arith.constant 0 : index
    %c1_46 = arith.constant 1 : index
    %29 = vector.load %arg4[%c0_44, %c0_45, %c1_46] : memref<8x16x20xf32, #tpu.memory_space<vmem>>, vector<8x16x16xf32>
    %30 = arith.addf %28, %29 : vector<8x16x16xf32>
    %c0_47 = arith.constant 0 : index
    %c0_48 = arith.constant 0 : index
    %c2_49 = arith.constant 2 : index
    %31 = vector.load %arg4[%c0_47, %c0_48, %c2_49] : memref<8x16x20xf32, #tpu.memory_space<vmem>>, vector<8x16x16xf32>
    %32 = arith.addf %30, %31 : vector<8x16x16xf32>
    %c0_50 = arith.constant 0 : index
    %c0_51 = arith.constant 0 : index
    %c3_52 = arith.constant 3 : index
    %33 = vector.load %arg4[%c0_50, %c0_51, %c3_52] : memref<8x16x20xf32, #tpu.memory_space<vmem>>, vector<8x16x16xf32>
    %34 = arith.addf %32, %33 : vector<8x16x16xf32>
    %c0_53 = arith.constant 0 : index
    %c0_54 = arith.constant 0 : index
    %c4_55 = arith.constant 4 : index
    %35 = vector.load %arg4[%c0_53, %c0_54, %c4_55] : memref<8x16x20xf32, #tpu.memory_space<vmem>>, vector<8x16x16xf32>
    %36 = arith.addf %34, %35 : vector<8x16x16xf32>
    %cst = arith.constant 4.000000e-02 : f32
    %37 = vector.broadcast %cst : f32 to vector<8x16x16xf32>
    %38 = arith.mulf %36, %37 : vector<8x16x16xf32>
    %c0_56 = arith.constant 0 : index
    %c0_57 = arith.constant 0 : index
    %c0_58 = arith.constant 0 : index
    %39 = vector.load %arg2[%c0_56, %c0_57, %c0_58] : memref<8x16x16xf32, #tpu.memory_space<vmem>>, vector<8x16x16xf32>
    tpu.vector_store %arg2[%c0_56, %c0_57, %c0_58], %38 {strides = array<i32>} : memref<8x16x16xf32, #tpu.memory_space<vmem>>, vector<8x16x16xf32>,
    return
  }
  func.func @transform_0(%arg0: i32) -> (i32, i32, i32) {
    %c0_i32 = arith.constant 0 : i32
    %c0_i32_0 = arith.constant 0 : i32
    %c0_i32_1 = arith.constant 0 : i32
    return %arg0, %c0_i32, %c0_i32_0 : i32, i32, i32
  }
  func.func @transform_1(%arg0: i32) -> (i32, i32, i32) {
    %c0_i32 = arith.constant 0 : i32
    %c0_i32_0 = arith.constant 0 : i32
    %c0_i32_1 = arith.constant 0 : i32
    return %arg0, %c0_i32, %c0_i32_0 : i32, i32, i32
  }
}

</mosaic_0001>

<bundles_post_ra>
// kernel: tpu_custom_call.1
= control target key start
LH: loop header
LB: loop body
LE: loop exit
PB: predicated region body
PF: predicated region fallthrough
CT: control target
= control target key end

     0   :  { %6 = vsyncpa [#allocation5], 0  ;;  %s1510_s0 = inlined_call_operand.hbm [shape: f32[8,16,16], index: 0, kind: input, shape index: {}]   ;;  %s1511_s1 = inlined_call_operand.hbm [shape: f32[8,16,16], index: 1, kind: output, shape index: {}]  }
   0x1   :  { %7 = vsyncpa [#allocation6], 0  ;;  %s12_s8 = sshll.u32 %s1510_s0, 4  ;;  %s933_s9 = smov [#allocation4]   ;;  %s13_s8 = int_to_ptr.hbm [resolvable:$true] %s12_s8 }
   0x2   :  { %s14_s10 = sshll.u32 %s933_s9, 4  ;;  %s934_s11 = smov 128   ;;  %s15_s10 = int_to_ptr.vmem [resolvable:$true] %s14_s10 }
   0x3   :  { %s935_s12 = smov 8  }
   0x4   :  { %20 = dma.hbm_to_vmem [thread:$0]  %s13_s8, 2048, %s15_s10, [#allocation5], %s934_s11, %s934_s11, %s935_s12  }
   0x5   :  { %929 = dma.done.wait [#allocation5], 2048  }
   0x6   :  { %930 = vsyncadd [#allocation5], 4294965248  ;;  %vm41_vm0 = vcmask 130048   ;;  %v29_v0 = vld [vmem:[#allocation4 + $0x20] sm:$0xff]  ;;  %v30_v1 = vld [vmem:[#allocation4 + $0x28] sm:$0xff]  ;;  %vm58_vm1 = vcmask 124930  }
   0x7   :  { %46 = vst.msk [vmem:[#allocation2 + $0x32] sm:$0xff] %vm41_vm0, %v29_v0  ;;  %vm76_vm2 = vcmask 123905   ;;  %v27_v2 = vld [vmem:[#allocation4 + $0x10] sm:$0xff]  ;;  %v28_v3 = vld [vmem:[#allocation4 + $0x18] sm:$0xff]  ;;  %v25_v4 = vld [vmem:[#allocation4] sm:$0xff]  ;;  %vm67_vm3 = vcmask 129030  }
   0x8   :  { %47 = vst.msk [vmem:[#allocation2 + $0x3a] sm:$0xff] %vm41_vm0, %v30_v1  ;;  %v26_v5 = vld [vmem:[#allocation4 + $0x8] sm:$0xff]  ;;  %vm85_vm4 = vcmask 128005   ;;  %v33_v25 = vld [vmem:[#allocation4 + $0x40] sm:$0xff]  ;;  %s936_s0 = smov 2   ;;  %v31_v49 = vld [vmem:[#allocation4 + $0x30] sm:$0xff] }
   0x9   :  { %61 = vst.msk [vmem:[#allocation2 + $0x2e] sm:$0x4] %vm58_vm1, %v29_v0  ;;  %v34_v26 = vld [vmem:[#allocation4 + $0x48] sm:$0xff]  ;;  %v32_v53 = vld [vmem:[#allocation4 + $0x38] sm:$0xff]  ;;  %v35_v63 = vld [vmem:[#allocation4 + $0x50] sm:$0xff]  ;;  %s937_s13 = smov 126  }
   0xa   :  { %79 = vst.msk [vmem:[#allocation2 + $0x30] sm:$0x2] %vm76_vm2, %v29_v0  ;;  %v36_v0 = vld [vmem:[#allocation4 + $0x58] sm:$0xff]  ;;  %s938_s14 = smov 4   ;;  %vm302_vm5 = vcmask 146448   ;;  %s939_s15 = smov 6  }
   0xb   :  { %44 = vst.msk [vmem:[#allocation2 + $0x1a] sm:$0xff] %vm41_vm0, %v27_v2  ;;  %vm367_vm6 = vcmask 7168   ;;  %vm432_vm7 = vcmask 154768   ;;  %vm449_vm8 = vcmask 15368   ;;  %vm514_vm9 = vcmask 162968   ;;  %s940_s16 = smov 127  }
   0xc   :  { %45 = vst.msk [vmem:[#allocation2 + $0x22] sm:$0xff] %vm41_vm0, %v28_v3  ;;  %s941_s17 = smov 125   ;;  %s942_s18 = smov 124  }
   0xd   :  { %60 = vst.msk [vmem:[#allocation2 + $0x16] sm:$0x4] %vm58_vm1, %v27_v2  ;;  %s943_s19 = smov [#allocation7]   ;;  %s857_s23 = sshll.u32 %s1511_s1, 4  ;;  %s858_s23 = int_to_ptr.hbm [resolvable:$true] %s857_s23 }
   0xe   :  { %78 = vst.msk [vmem:[#allocation2 + $0x18] sm:$0x2] %vm76_vm2, %v27_v2  ;;  %v146_v10 = vld [vmem:[#allocation2 + $0x32] sm:$0xff]  ;;  %s855_s20 = sshll.u32 %s943_s19, 4  ;;  %s856_s20 = int_to_ptr.vmem [resolvable:$true] %s855_s20 }
   0xf   :  { %42 = vst.msk [vmem:[#allocation2 + $0x2] sm:$0xff] %vm41_vm0, %v25_v4  ;;  %v99_v6 = vld [vmem:[#allocation2 + $0x38] sm:$0xff] }
  0x10   :  { %43 = vst.msk [vmem:[#allocation2 + $0xa] sm:$0xff] %vm41_vm0, %v26_v5  ;;  %v115_v7 = vld [vmem:[#allocation2 + $0x39] sm:$0xff] }
  0x11   :  { %v98_v8 = vld [vmem:[#allocation2 + $0x30] sm:$0xff]  ;;  %59 = vst.msk [vmem:[#allocation2 - $0x2] sm:$0x4] %vm58_vm1, %v25_v4  ;;  %v131_v13 = vadd.f32 %v115_v7, %v99_v6  ;;  %v147_v17 = vld [vmem:[#allocation2 + $0x3a] sm:$0xff] }
  0x12   :  { %v114_v9 = vld [vmem:[#allocation2 + $0x31] sm:$0xff]  ;;  %77 = vst.msk [vmem:[#allocation2] sm:$0x2] %vm76_vm2, %v25_v4  ;;  %v144_v21 = vld [vmem:[#allocation2 + $0x1a] sm:$0xff] }
  0x13   :  { %v130_v11 = vadd.f32 %v114_v9, %v98_v8  ;;  %v178_v12 = vld [vmem:[#allocation2 + $0x33] sm:$0xff]  ;;  %70 = vst.msk [vmem:[#allocation2 + $0x3c] sm:$0x40] %vm67_vm3, %v30_v1  ;;  %v97_v14 = vld [vmem:[#allocation2 + $0x20] sm:$0xff]  ;;  %v163_v28 = vadd.f32 %v147_v17, %v131_v13 }
  0x14   :  { %v210_v16 = vld [vmem:[#allocation2 + $0x34] sm:$0xff]  ;;  %88 = vst.msk [vmem:[#allocation2 + $0x3e] sm:$0x20] %vm85_vm4, %v30_v1  ;;  %v113_v18 = vld [vmem:[#allocation2 + $0x21] sm:$0xff] }
  0x15   :  { %v162_v15 = vadd.f32 %v146_v10, %v130_v11  ;;  %v96_v19 = vld [vmem:[#allocation2 + $0x18] sm:$0xff]  ;;  %68 = vst.msk [vmem:[#allocation2 + $0xc] sm:$0x40] %vm67_vm3, %v26_v5  ;;  %v129_v24 = vadd.f32 %v113_v18, %v97_v14  ;;  %v145_v29 = vld [vmem:[#allocation2 + $0x22] sm:$0xff]  ;;  %v39_v14 = vld [vmem:[#allocation4 + $0x70] sm:$0xff] }
  0x16   :  { %v112_v20 = vld [vmem:[#allocation2 + $0x19] sm:$0xff]  ;;  %69 = vst.msk [vmem:[#allocation2 + $0x24] sm:$0x40] %vm67_vm3, %v28_v3  ;;  %v142_v37 = vld [vmem:[#allocation2 + $0x2] sm:$0xff] }
  0x17   :  { %v194_v22 = vadd.f32 %v178_v12, %v162_v15  ;;  %v128_v23 = vadd.f32 %v112_v20, %v96_v19  ;;  %v176_v27 = vld [vmem:[#allocation2 + $0x1b] sm:$0xff]  ;;  %86 = vst.msk [vmem:[#allocation2 + $0xe] sm:$0x20] %vm85_vm4, %v26_v5  ;;  %v95_v30 = vld [vmem:[#allocation2 + $0x8] sm:$0xff]  ;;  %v161_v42 = vadd.f32 %v145_v29, %v129_v24 }
  0x18   :  { %v208_v33 = vld [vmem:[#allocation2 + $0x1c] sm:$0xff]  ;;  %87 = vst.msk [vmem:[#allocation2 + $0x26] sm:$0x20] %vm85_vm4, %v28_v3  ;;  %v111_v34 = vld [vmem:[#allocation2 + $0x9] sm:$0xff] }
  0x19   :  { %v977_v31 = vadd.f32 %v210_v16, %v194_v22  ;;  %v160_v32 = vadd.f32 %v144_v21, %v128_v23  ;;  %v94_v35 = vld [vmem:[#allocation2] sm:$0xff]  ;;  %v127_v38 = vadd.f32 %v111_v34, %v95_v30  ;;  %50 = vst.msk [vmem:[#allocation2 + $0x62] sm:$0xff] %vm41_vm0, %v33_v25  ;;  %v143_v43 = vld [vmem:[#allocation2 + $0xa] sm:$0xff]  ;;  %v40_v15 = vld [vmem:[#allocation4 + $0x78] sm:$0xff] }
  0x1a   :  { %v110_v36 = vld [vmem:[#allocation2 + $0x1] sm:$0xff]  ;;  %51 = vst.msk [vmem:[#allocation2 + $0x6a] sm:$0xff] %vm41_vm0, %v34_v26 }
  0x1b   :  { %262 = vrot.lane.b32.xlu2 %v977_v31, %s936_s0  ;;  %v192_v39 = vadd.f32 %v176_v27, %v160_v32  ;;  %v126_v40 = vadd.f32 %v110_v36, %v94_v35  ;;  %v179_v41 = vld [vmem:[#allocation2 + $0x3b] sm:$0xff]  ;;  %v174_v44 = vld [vmem:[#allocation2 + $0x3] sm:$0xff]  ;;  %63 = vst.msk [vmem:[#allocation2 + $0x5e] sm:$0x4] %vm58_vm1, %v33_v25  ;;  %v159_v52 = vadd.f32 %v143_v43, %v127_v38 }
  0x1c   :  { %v195_v45 = vadd.f32 %v179_v41, %v163_v28  ;;  %v211_v46 = vld [vmem:[#allocation2 + $0x3c] sm:$0xff]  ;;  %81 = vst.msk [vmem:[#allocation2 + $0x60] sm:$0x2] %vm76_vm2, %v33_v25  ;;  %v206_v50 = vld [vmem:[#allocation2 + $0x4] sm:$0xff] }
  0x1d   :  { %v985_v47 = vadd.f32 %v208_v33, %v192_v39  ;;  %v158_v48 = vadd.f32 %v142_v37, %v126_v40  ;;  %v177_v51 = vld [vmem:[#allocation2 + $0x23] sm:$0xff]  ;;  %72 = vst.msk [vmem:[#allocation2 + $0x6c] sm:$0x40] %vm67_vm3, %v34_v26  ;;  %v175_v58 = vld [vmem:[#allocation2 + $0xb] sm:$0xff] }
  0x1e   :  { %v991_v55 = vadd.f32 %v211_v46, %v195_v45  ;;  %v193_v56 = vadd.f32 %v177_v51, %v161_v42  ;;  %90 = vst.msk [vmem:[#allocation2 + $0x6e] sm:$0x20] %vm85_vm4, %v34_v26  ;;  %v191_v61 = vadd.f32 %v175_v58, %v159_v52  ;;  %v207_v62 = vld [vmem:[#allocation2 + $0xc] sm:$0xff]  ;;  %v37_v37 = vld [vmem:[#allocation4 + $0x60] sm:$0xff] }
  0x1f   :  { %258 = vrot.lane.b32.xlu1 %v985_v47, %s936_s0  ;;  %v190_v54 = vadd.f32 %v174_v44, %v158_v48  ;;  %v209_v57 = vld [vmem:[#allocation2 + $0x24] sm:$0xff]  ;;  %48 = vst.msk [vmem:[#allocation2 + $0x4a] sm:$0xff] %vm41_vm0, %v31_v49 }
  0x20   :  { %49 = vst.msk [vmem:[#allocation2 + $0x52] sm:$0xff] %vm41_vm0, %v32_v53  ;;  %v1003_v60 = vadd.f32 %v209_v57, %v193_v56  ;;  %v150_v3 = vld [vmem:[#allocation2 + $0x62] sm:$0xff]  ;;  %v1011_v6 = vadd.f32 %v207_v62, %v191_v61 }
  0x21   :  { %v995_v59 = vadd.f32 %v206_v50, %v190_v54  ;;  %71 = vst.msk [vmem:[#allocation2 + $0x54] sm:$0x40] %vm67_vm3, %v32_v53  ;;  %v182_v5 = vld [vmem:[#allocation2 + $0x63] sm:$0xff] }
  0x22   :  { %89 = vst.msk [vmem:[#allocation2 + $0x56] sm:$0x20] %vm85_vm4, %v32_v53  ;;  %v214_v8 = vld [vmem:[#allocation2 + $0x64] sm:$0xff] }
  0x23   :  { %254 = vrot.lane.b32.xlu0 %v995_v59, %s936_s0  ;;  %264 = vrot.lane.b32.xlu2 %v991_v55, %s936_s0  ;;  %v102_v1 = vld [vmem:[#allocation2 + $0x60] sm:$0xff]  ;;  %62 = vst.msk [vmem:[#allocation2 + $0x46] sm:$0x4] %vm58_vm1, %v31_v49  ;;  %v103_v17 = vld [vmem:[#allocation2 + $0x68] sm:$0xff] }
  0x24   :  { %v118_v2 = vld [vmem:[#allocation2 + $0x61] sm:$0xff]  ;;  %80 = vst.msk [vmem:[#allocation2 + $0x48] sm:$0x2] %vm76_vm2, %v31_v49  ;;  %v119_v18 = vld [vmem:[#allocation2 + $0x69] sm:$0xff] }
  0x25   :  { %v134_v4 = vadd.f32 %v118_v2, %v102_v1  ;;  %52 = vst.msk [vmem:[#allocation2 + $0x7a] sm:$0xff] %vm41_vm0, %v35_v63  ;;  %v135_v28 = vadd.f32 %v119_v18, %v103_v17  ;;  %v151_v29 = vld [vmem:[#allocation2 + $0x6a] sm:$0xff] }
  0x26   :  { %53 = vst.msk [vmem:[#allocation2 + $0x82] sm:$0xff] %vm41_vm0, %v36_v0  ;;  %v148_v21 = vld [vmem:[#allocation2 + $0x4a] sm:$0xff] }
  0x27   :  { %260 = vrot.lane.b32.xlu1 %v1003_v60, %s936_s0  ;;  %v166_v7 = vadd.f32 %v150_v3, %v134_v4  ;;  %v101_v9 = vld [vmem:[#allocation2 + $0x50] sm:$0xff]  ;;  %73 = vst.msk [vmem:[#allocation2 + $0x84] sm:$0x40] %vm67_vm3, %v36_v0  ;;  %v38_v40 = vld [vmem:[#allocation4 + $0x68] sm:$0xff]  ;;  %v167_v44 = vadd.f32 %v151_v29, %v135_v28 }
  0x28   :  { %v117_v10 = vld [vmem:[#allocation2 + $0x51] sm:$0xff]  ;;  %91 = vst.msk [vmem:[#allocation2 + $0x86] sm:$0x20] %vm85_vm4, %v36_v0 }
  0x29   :  { %v149_v11 = vld [vmem:[#allocation2 + $0x52] sm:$0xff]  ;;  %v198_v12 = vadd.f32 %v182_v5, %v166_v7  ;;  %v133_v13 = vadd.f32 %v117_v10, %v101_v9  ;;  %64 = vst.msk [vmem:[#allocation2 + $0x76] sm:$0x4] %vm58_vm1, %v35_v63 }
  0x2a   :  { %v181_v16 = vld [vmem:[#allocation2 + $0x53] sm:$0xff]  ;;  %82 = vst.msk [vmem:[#allocation2 + $0x78] sm:$0x2] %vm76_vm2, %v35_v63  ;;  %v180_v27 = vld [vmem:[#allocation2 + $0x4b] sm:$0xff] }
  0x2b   :  { %256 = vrot.lane.b32.xlu0 %v1011_v6, %s936_s0  ;;  %v1019_v19 = vadd.f32 %v214_v8, %v198_v12  ;;  %v165_v20 = vadd.f32 %v149_v11, %v133_v13  ;;  %v213_v22 = vld [vmem:[#allocation2 + $0x54] sm:$0xff]  ;;  %v100_v23 = vld [vmem:[#allocation2 + $0x48] sm:$0xff]  ;;  %56 = vst.msk [vmem:[#allocation2 + $0xaa] sm:$0xff] %vm41_vm0, %v39_v14 }
  0x2c   :  { %v116_v24 = vld [vmem:[#allocation2 + $0x49] sm:$0xff]  ;;  %57 = vst.msk [vmem:[#allocation2 + $0xb2] sm:$0xff] %vm41_vm0, %v40_v15  ;;  %v152_v43 = vld [vmem:[#allocation2 + $0x7a] sm:$0xff] }
  0x2d   :  { %270 = vrot.lane.b32.xlu2 %v1019_v19, %s936_s0  ;;  %v197_v25 = vadd.f32 %v181_v16, %v165_v20  ;;  %v132_v26 = vadd.f32 %v116_v24, %v100_v23  ;;  %v105_v30 = vld [vmem:[#allocation2 + $0x80] sm:$0xff]  ;;  %66 = vst.msk [vmem:[#allocation2 + $0xa6] sm:$0x4] %vm58_vm1, %v39_v14  ;;  %v212_v38 = vld [vmem:[#allocation2 + $0x4c] sm:$0xff] }
  0x2e   :  { %v121_v32 = vld [vmem:[#allocation2 + $0x81] sm:$0xff]  ;;  %84 = vst.msk [vmem:[#allocation2 + $0xa8] sm:$0x2] %vm76_vm2, %v39_v14  ;;  %v183_v45 = vld [vmem:[#allocation2 + $0x6b] sm:$0xff] }
  0x2f   :  { %v153_v33 = vld [vmem:[#allocation2 + $0x82] sm:$0xff]  ;;  %v1027_v34 = vadd.f32 %v213_v22, %v197_v25  ;;  %v164_v35 = vadd.f32 %v148_v21, %v132_v26  ;;  %v137_v36 = vadd.f32 %v121_v32, %v105_v30  ;;  %75 = vst.msk [vmem:[#allocation2 + $0xb4] sm:$0x40] %vm67_vm3, %v40_v15  ;;  %v199_v58 = vadd.f32 %v183_v45, %v167_v44  ;;  %v215_v61 = vld [vmem:[#allocation2 + $0x6c] sm:$0xff] }
  0x30   :  { %v185_v39 = vld [vmem:[#allocation2 + $0x83] sm:$0xff]  ;;  %93 = vst.msk [vmem:[#allocation2 + $0xb6] sm:$0x20] %vm85_vm4, %v40_v15  ;;  %v184_v53 = vld [vmem:[#allocation2 + $0x7b] sm:$0xff] }
  0x31   :  { %268 = vrot.lane.b32.xlu1 %v1027_v34, %s936_s0  ;;  %v196_v41 = vadd.f32 %v180_v27, %v164_v35  ;;  %v169_v42 = vadd.f32 %v153_v33, %v137_v36  ;;  %v217_v46 = vld [vmem:[#allocation2 + $0x84] sm:$0xff]  ;;  %v104_v48 = vld [vmem:[#allocation2 + $0x78] sm:$0xff]  ;;  %54 = vst.msk [vmem:[#allocation2 + $0x92] sm:$0xff] %vm41_vm0, %v37_v37  ;;  %v1050_v5 = vadd.f32 %v215_v61, %v199_v58 }
  0x32   :  { %v120_v49 = vld [vmem:[#allocation2 + $0x79] sm:$0xff]  ;;  %55 = vst.msk [vmem:[#allocation2 + $0x9a] sm:$0xff] %vm41_vm0, %v38_v40  ;;  %v156_v0 = vld [vmem:[#allocation2 + $0xaa] sm:$0xff] }
  0x33   :  { %v1035_v50 = vadd.f32 %v212_v38, %v196_v41  ;;  %v201_v51 = vadd.f32 %v185_v39, %v169_v42  ;;  %v136_v52 = vadd.f32 %v120_v49, %v104_v48  ;;  %74 = vst.msk [vmem:[#allocation2 + $0x9c] sm:$0x40] %vm67_vm3, %v38_v40  ;;  %v216_v57 = vld [vmem:[#allocation2 + $0x7c] sm:$0xff]  ;;  %v188_v3 = vld [vmem:[#allocation2 + $0xab] sm:$0xff] }
  0x34   :  { %92 = vst.msk [vmem:[#allocation2 + $0x9e] sm:$0x20] %vm85_vm4, %v38_v40  ;;  %v220_v8 = vld [vmem:[#allocation2 + $0xac] sm:$0xff] }
  0x35   :  { %266 = vrot.lane.b32.xlu0 %v1035_v50, %s936_s0  ;;  %v1041_v54 = vadd.f32 %v217_v46, %v201_v51  ;;  %v168_v56 = vadd.f32 %v152_v43, %v136_v52  ;;  %v108_v62 = vld [vmem:[#allocation2 + $0xa8] sm:$0xff]  ;;  %65 = vst.msk [vmem:[#allocation2 + $0x8e] sm:$0x4] %vm58_vm1, %v37_v37  ;;  %v109_v15 = vld [vmem:[#allocation2 + $0xb0] sm:$0xff] }
  0x36   :  { %v124_v63 = vld [vmem:[#allocation2 + $0xa9] sm:$0xff]  ;;  %83 = vst.msk [vmem:[#allocation2 + $0x90] sm:$0x2] %vm76_vm2, %v37_v37  ;;  %v125_v16 = vld [vmem:[#allocation2 + $0xb1] sm:$0xff] }
  0x37   :  { %276 = vrot.lane.b32.xlu2 %v1041_v54, %s936_s0  ;;  %v200_v1 = vadd.f32 %v184_v53, %v168_v56  ;;  %v140_v2 = vadd.f32 %v124_v63, %v108_v62  ;;  %v141_v26 = vadd.f32 %v125_v16, %v109_v15  ;;  %v157_v28 = vld [vmem:[#allocation2 + $0xb2] sm:$0xff] }
  0x38   :  { %v154_v20 = vld [vmem:[#allocation2 + $0x92] sm:$0xff] }
  0x39   :  { %v1048_v4 = vadd.f32 %v216_v57, %v200_v1  ;;  %v172_v7 = vadd.f32 %v156_v0, %v140_v2  ;;  %v107_v9 = vld [vmem:[#allocation2 + $0x98] sm:$0xff]  ;;  %v173_v35 = vadd.f32 %v157_v28, %v141_v26 }
  0x3a   :  { %v123_v10 = vld [vmem:[#allocation2 + $0x99] sm:$0xff] }
  0x3b   :  { %v155_v11 = vld [vmem:[#allocation2 + $0x9a] sm:$0xff]  ;;  %274 = vrot.lane.b32.xlu1 %v1048_v4, %s936_s0  ;;  %v204_v12 = vadd.f32 %v188_v3, %v172_v7  ;;  %v139_v13 = vadd.f32 %v123_v10, %v107_v9 }
  0x3c   :  { %v187_v14 = vld [vmem:[#allocation2 + $0x9b] sm:$0xff]  ;;  %v186_v27 = vld [vmem:[#allocation2 + $0x93] sm:$0xff] }
  0x3d   :  { %272 = vrot.lane.b32.xlu0 %v1050_v5, %s936_s0  ;;  %v1056_v17 = vadd.f32 %v220_v8, %v204_v12  ;;  %v171_v18 = vadd.f32 %v155_v11, %v139_v13  ;;  %v219_v21 = vld [vmem:[#allocation2 + $0x9c] sm:$0xff]  ;;  %v106_v22 = vld [vmem:[#allocation2 + $0x90] sm:$0xff] }
  0x3e   :  { %v122_v23 = vld [vmem:[#allocation2 + $0x91] sm:$0xff] }
  0x3f   :  { %282 = vrot.lane.b32.xlu2 %v1056_v17, %s936_s0  ;;  %v203_v24 = vadd.f32 %v187_v14, %v171_v18  ;;  %v138_v25 = vadd.f32 %v122_v23, %v106_v22  ;;  %v218_v32 = vld [vmem:[#allocation2 + $0x94] sm:$0xff] }
  0x40   :  { %v189_v36 = vld [vmem:[#allocation2 + $0xb3] sm:$0xff] }
  0x41   :  { %v1060_v29 = vadd.f32 %v219_v21, %v203_v24  ;;  %v170_v30 = vadd.f32 %v154_v20, %v138_v25  ;;  %v205_v38 = vadd.f32 %v189_v36, %v173_v35  ;;  %v221_v39 = vld [vmem:[#allocation2 + $0xb4] sm:$0xff] }
  0x43   :  { %280 = vrot.lane.b32.xlu1 %v1060_v29, %s936_s0  ;;  %v202_v33 = vadd.f32 %v186_v27, %v170_v30  ;;  %v1072_v40 = vadd.f32 %v221_v39, %v205_v38 }
  0x45   :  { %v1064_v37 = vadd.f32 %v218_v32, %v202_v33 }
  0x47   :  { %278 = vrot.lane.b32.xlu0 %v1064_v37, %s936_s0  ;;  %321 = vrot.lane.b32.xlu2 %v1011_v6, %s937_s13 }
  0x4b   :  { %319 = vrot.lane.b32.xlu1 %v995_v59, %s937_s13 }
  0x4f   :  { %284 = vrot.lane.b32.xlu0 %v1072_v40, %s936_s0  ;;  %327 = vrot.lane.b32.xlu2 %v977_v31, %s937_s13 }
  0x53   :  { %325 = vrot.lane.b32.xlu1 %v1003_v60, %s937_s13 }
  0x57   :  { %323 = vrot.lane.b32.xlu0 %v985_v47, %s937_s13  ;;  %333 = vrot.lane.b32.xlu2 %v1027_v34, %s937_s13 }
  0x5b   :  { %331 = vrot.lane.b32.xlu1 %v1035_v50, %s937_s13 }
  0x5f   :  { %329 = vrot.lane.b32.xlu0 %v991_v55, %s937_s13  ;;  %339 = vrot.lane.b32.xlu2 %v1048_v4, %s937_s13 }
  0x63   :  { %337 = vrot.lane.b32.xlu1 %v1050_v5, %s937_s13 }
  0x67   :  { %335 = vrot.lane.b32.xlu0 %v1019_v19, %s937_s13  ;;  %345 = vrot.lane.b32.xlu2 %v1060_v29, %s937_s13 }
  0x6b   :  { %343 = vrot.lane.b32.xlu1 %v1064_v37, %s937_s13 }
  0x6f   :  { %341 = vrot.lane.b32.xlu0 %v1041_v54, %s937_s13  ;;  %384 = vrot.lane.b32.xlu2 %v995_v59, %s938_s14 }
  0x73   :  { %349 = vrot.lane.b32.xlu1 %v1072_v40, %s937_s13 }
  0x75   :  { %v263_v41 = vpop.permute.xlu2 %262 }
  0x76   :  { %307 = vst.msk [vmem:[#allocation3 + $0x20] sm:$0xff] %vm302_vm5, %v263_v41 }
  0x77   :  { %347 = vrot.lane.b32.xlu0 %v1056_v17, %s937_s13  ;;  %390 = vrot.lane.b32.xlu2 %v1003_v60, %s938_s14 }
  0x7b   :  { %388 = vrot.lane.b32.xlu1 %v985_v47, %s938_s14 }
  0x7d   :  { %v265_v42 = vpop.permute.xlu2 %264 }
  0x7e   :  { %308 = vst.msk [vmem:[#allocation3 + $0x28] sm:$0xff] %vm302_vm5, %v265_v42 }
  0x7f   :  { %386 = vrot.lane.b32.xlu0 %v1011_v6, %s938_s14  ;;  %396 = vrot.lane.b32.xlu2 %v1035_v50, %s938_s14 }
  0x83   :  { %394 = vrot.lane.b32.xlu1 %v991_v55, %s938_s14 }
  0x87   :  { %392 = vrot.lane.b32.xlu0 %v977_v31, %s938_s14  ;;  %402 = vrot.lane.b32.xlu2 %v1050_v5, %s938_s14  ;;  %v271_v43 = vpop.permute.xlu2 %270 }
  0x88   :  { %311 = vst.msk [vmem:[#allocation3 + $0x40] sm:$0xff] %vm302_vm5, %v271_v43 }
  0x8b   :  { %400 = vrot.lane.b32.xlu1 %v1019_v19, %s938_s14 }
  0x8f   :  { %398 = vrot.lane.b32.xlu0 %v1027_v34, %s938_s14  ;;  %408 = vrot.lane.b32.xlu2 %v1064_v37, %s938_s14 }
  0x91   :  { %v277_v44 = vpop.permute.xlu2 %276  ;;  %v259_v45 = vpop.permute.xlu1 %258 }
  0x92   :  { %314 = vst.msk [vmem:[#allocation3 + $0x58] sm:$0xff] %vm302_vm5, %v277_v44 }
  0x93   :  { %406 = vrot.lane.b32.xlu1 %v1041_v54, %s938_s14  ;;  %305 = vst.msk [vmem:[#allocation3 + $0x10] sm:$0xff] %vm302_vm5, %v259_v45 }
  0x95   :  { %v255_v46 = vpop.permute.xlu0 %254 }
  0x96   :  { %303 = vst.msk [vmem:[#allocation3] sm:$0xff] %vm302_vm5, %v255_v46 }
  0x97   :  { %404 = vrot.lane.b32.xlu0 %v1048_v4, %s938_s14  ;;  %414 = vrot.lane.b32.xlu2 %v1072_v40, %s938_s14 }
  0x99   :  { %v283_v48 = vpop.permute.xlu2 %282  ;;  %v261_v49 = vpop.permute.xlu1 %260 }
  0x9a   :  { %317 = vst.msk [vmem:[#allocation3 + $0x70] sm:$0xff] %vm302_vm5, %v283_v48 }
  0x9b   :  { %412 = vrot.lane.b32.xlu1 %v1056_v17, %s938_s14  ;;  %306 = vst.msk [vmem:[#allocation3 + $0x18] sm:$0xff] %vm302_vm5, %v261_v49 }
  0x9d   :  { %v257_v51 = vpop.permute.xlu0 %256 }
  0x9e   :  { %304 = vst.msk [vmem:[#allocation3 + $0x8] sm:$0xff] %vm302_vm5, %v257_v51 }
  0x9f   :  { %410 = vrot.lane.b32.xlu0 %v1060_v29, %s938_s14  ;;  %470 = vrot.lane.b32.xlu2 %v985_v47, %s939_s15 }
  0xa1   :  { %v322_v52 = vpop.permute.xlu2 %321 }
  0xa2   :  { %369 = vst.msk [vmem:[#allocation3 + $0x8] sm:$0xff] %vm367_vm6, %v322_v52 }
  0xa3   :  { %468 = vrot.lane.b32.xlu1 %v1011_v6, %s939_s15  ;;  %v269_v53 = vpop.permute.xlu1 %268 }
  0xa4   :  { %310 = vst.msk [vmem:[#allocation3 + $0x38] sm:$0xff] %vm302_vm5, %v269_v53 }
  0xa7   :  { %466 = vrot.lane.b32.xlu0 %v995_v59, %s939_s15  ;;  %v267_v56 = vpop.permute.xlu0 %266  ;;  %476 = vrot.lane.b32.xlu2 %v991_v55, %s939_s15 }
  0xa8   :  { %309 = vst.msk [vmem:[#allocation3 + $0x30] sm:$0xff] %vm302_vm5, %v267_v56 }
  0xa9   :  { %v328_v57 = vpop.permute.xlu2 %327 }
  0xaa   :  { %372 = vst.msk [vmem:[#allocation3 + $0x20] sm:$0xff] %vm367_vm6, %v328_v57 }
  0xab   :  { %474 = vrot.lane.b32.xlu1 %v977_v31, %s939_s15 }
  0xad   :  { %v275_v58 = vpop.permute.xlu1 %274 }
  0xae   :  { %313 = vst.msk [vmem:[#allocation3 + $0x50] sm:$0xff] %vm302_vm5, %v275_v58 }
  0xaf   :  { %472 = vrot.lane.b32.xlu0 %v1003_v60, %s939_s15  ;;  %v273_v61 = vpop.permute.xlu0 %272  ;;  %482 = vrot.lane.b32.xlu2 %v1019_v19, %s939_s15 }
  0xb0   :  { %312 = vst.msk [vmem:[#allocation3 + $0x48] sm:$0xff] %vm302_vm5, %v273_v61 }
  0xb1   :  { %v334_v62 = vpop.permute.xlu2 %333 }
  0xb2   :  { %375 = vst.msk [vmem:[#allocation3 + $0x38] sm:$0xff] %vm367_vm6, %v334_v62 }
  0xb3   :  { %480 = vrot.lane.b32.xlu1 %v1027_v34, %s939_s15 }
  0xb5   :  { %v281_v63 = vpop.permute.xlu1 %280 }
  0xb6   :  { %316 = vst.msk [vmem:[#allocation3 + $0x68] sm:$0xff] %vm302_vm5, %v281_v63 }
  0xb7   :  { %478 = vrot.lane.b32.xlu0 %v1035_v50, %s939_s15  ;;  %488 = vrot.lane.b32.xlu2 %v1041_v54, %s939_s15 }
  0xb9   :  { %v279_v0 = vpop.permute.xlu0 %278  ;;  %v340_v1 = vpop.permute.xlu2 %339 }
  0xba   :  { %315 = vst.msk [vmem:[#allocation3 + $0x60] sm:$0xff] %vm302_vm5, %v279_v0 }
  0xbb   :  { %486 = vrot.lane.b32.xlu1 %v1048_v4, %s939_s15  ;;  %378 = vst.msk [vmem:[#allocation3 + $0x50] sm:$0xff] %vm367_vm6, %v340_v1 }
  0xbd   :  { %v320_v2 = vpop.permute.xlu1 %319 }
  0xbe   :  { %368 = vst.msk [vmem:[#allocation3] sm:$0xff] %vm367_vm6, %v320_v2 }
  0xbf   :  { %484 = vrot.lane.b32.xlu0 %v1050_v5, %s939_s15  ;;  %494 = vrot.lane.b32.xlu2 %v1056_v17, %s939_s15 }
  0xc1   :  { %v285_v3 = vpop.permute.xlu0 %284  ;;  %v346_v7 = vpop.permute.xlu2 %345 }
  0xc2   :  { %318 = vst.msk [vmem:[#allocation3 + $0x78] sm:$0xff] %vm302_vm5, %v285_v3 }
  0xc3   :  { %492 = vrot.lane.b32.xlu1 %v1060_v29, %s939_s15  ;;  %381 = vst.msk [vmem:[#allocation3 + $0x68] sm:$0xff] %vm367_vm6, %v346_v7 }
  0xc5   :  { %v326_v8 = vpop.permute.xlu1 %325 }
  0xc6   :  { %371 = vst.msk [vmem:[#allocation3 + $0x18] sm:$0xff] %vm367_vm6, %v326_v8 }
  0xc7   :  { %490 = vrot.lane.b32.xlu0 %v1064_v37, %s939_s15 }
  0xc9   :  { %v324_v9 = vpop.permute.xlu0 %323  ;;  %v385_v10 = vpop.permute.xlu2 %384 }
  0xca   :  { %370 = vst.msk [vmem:[#allocation3 + $0x10] sm:$0xff] %vm367_vm6, %v324_v9 }
  0xcb   :  { %433 = vst.msk [vmem:[#allocation3] sm:$0xff] %vm432_vm7, %v385_v10 }
  0xcc   :  { %450 = vst.msk [vmem:[#allocation3] sm:$0xff] %vm449_vm8, %v995_v59 }
  0xcd   :  { %v332_v11 = vpop.permute.xlu1 %331 }
  0xce   :  { %374 = vst.msk [vmem:[#allocation3 + $0x30] sm:$0xff] %vm367_vm6, %v332_v11 }
  0xcf   :  { %496 = vrot.lane.b32.xlu0 %v1072_v40, %s939_s15 }
  0xd1   :  { %v330_v12 = vpop.permute.xlu0 %329  ;;  %v391_v13 = vpop.permute.xlu2 %390 }
  0xd2   :  { %373 = vst.msk [vmem:[#allocation3 + $0x28] sm:$0xff] %vm367_vm6, %v330_v12 }
  0xd3   :  { %436 = vst.msk [vmem:[#allocation3 + $0x18] sm:$0xff] %vm432_vm7, %v391_v13 }
  0xd4   :  { %453 = vst.msk [vmem:[#allocation3 + $0x18] sm:$0xff] %vm449_vm8, %v1003_v60 }
  0xd5   :  { %v338_v14 = vpop.permute.xlu1 %337 }
  0xd6   :  { %377 = vst.msk [vmem:[#allocation3 + $0x48] sm:$0xff] %vm367_vm6, %v338_v14 }
  0xd9   :  { %v336_v15 = vpop.permute.xlu0 %335  ;;  %v397_v16 = vpop.permute.xlu2 %396 }
  0xda   :  { %376 = vst.msk [vmem:[#allocation3 + $0x40] sm:$0xff] %vm367_vm6, %v336_v15 }
  0xdb   :  { %439 = vst.msk [vmem:[#allocation3 + $0x30] sm:$0xff] %vm432_vm7, %v397_v16 }
  0xdc   :  { %456 = vst.msk [vmem:[#allocation3 + $0x30] sm:$0xff] %vm449_vm8, %v1035_v50 }
  0xdd   :  { %v344_v18 = vpop.permute.xlu1 %343 }
  0xde   :  { %380 = vst.msk [vmem:[#allocation3 + $0x60] sm:$0xff] %vm367_vm6, %v344_v18 }
  0xe1   :  { %v342_v20 = vpop.permute.xlu0 %341  ;;  %v403_v21 = vpop.permute.xlu2 %402 }
  0xe2   :  { %379 = vst.msk [vmem:[#allocation3 + $0x58] sm:$0xff] %vm367_vm6, %v342_v20 }
  0xe3   :  { %442 = vst.msk [vmem:[#allocation3 + $0x48] sm:$0xff] %vm432_vm7, %v403_v21 }
  0xe4   :  { %459 = vst.msk [vmem:[#allocation3 + $0x48] sm:$0xff] %vm449_vm8, %v1050_v5 }
  0xe5   :  { %v350_v22 = vpop.permute.xlu1 %349 }
  0xe6   :  { %383 = vst.msk [vmem:[#allocation3 + $0x78] sm:$0xff] %vm367_vm6, %v350_v22 }
  0xe9   :  { %v348_v59 = vpop.permute.xlu0 %347  ;;  %v409_v23 = vpop.permute.xlu2 %408 }
  0xea   :  { %382 = vst.msk [vmem:[#allocation3 + $0x70] sm:$0xff] %vm367_vm6, %v348_v59 }
  0xeb   :  { %445 = vst.msk [vmem:[#allocation3 + $0x60] sm:$0xff] %vm432_vm7, %v409_v23 }
  0xec   :  { %462 = vst.msk [vmem:[#allocation3 + $0x60] sm:$0xff] %vm449_vm8, %v1064_v37 }
  0xed   :  { %v389_v60 = vpop.permute.xlu1 %388 }
  0xee   :  { %435 = vst.msk [vmem:[#allocation3 + $0x10] sm:$0xff] %vm432_vm7, %v389_v60 }
  0xef   :  { %452 = vst.msk [vmem:[#allocation3 + $0x10] sm:$0xff] %vm449_vm8, %v985_v47 }
  0xf1   :  { %v387_v50 = vpop.permute.xlu0 %386  ;;  %v415_v5 = vpop.permute.xlu2 %414 }
  0xf2   :  { %434 = vst.msk [vmem:[#allocation3 + $0x8] sm:$0xff] %vm432_vm7, %v387_v50 }
  0xf3   :  { %448 = vst.msk [vmem:[#allocation3 + $0x78] sm:$0xff] %vm432_vm7, %v415_v5 }
  0xf4   :  { %451 = vst.msk [vmem:[#allocation3 + $0x8] sm:$0xff] %vm449_vm8, %v1011_v6 }
  0xf5   :  { %v395_v24 = vpop.permute.xlu1 %394  ;;  %465 = vst.msk [vmem:[#allocation3 + $0x78] sm:$0xff] %vm449_vm8, %v1072_v40 }
  0xf6   :  { %438 = vst.msk [vmem:[#allocation3 + $0x28] sm:$0xff] %vm432_vm7, %v395_v24 }
  0xf7   :  { %455 = vst.msk [vmem:[#allocation3 + $0x28] sm:$0xff] %vm449_vm8, %v991_v55 }
  0xf9   :  { %v393_v47 = vpop.permute.xlu0 %392  ;;  %v471_v25 = vpop.permute.xlu2 %470 }
  0xfa   :  { %437 = vst.msk [vmem:[#allocation3 + $0x20] sm:$0xff] %vm432_vm7, %v393_v47 }
  0xfb   :  { %517 = vst.msk [vmem:[#allocation3 + $0x10] sm:$0xff] %vm514_vm9, %v471_v25 }
  0xfc   :  { %454 = vst.msk [vmem:[#allocation3 + $0x20] sm:$0xff] %vm449_vm8, %v977_v31 }
  0xfd   :  { %v401_v6 = vpop.permute.xlu1 %400 }
  0xfe   :  { %441 = vst.msk [vmem:[#allocation3 + $0x40] sm:$0xff] %vm432_vm7, %v401_v6 }
  0xff   :  { %458 = vst.msk [vmem:[#allocation3 + $0x40] sm:$0xff] %vm449_vm8, %v1019_v19 }
 0x101   :  { %v399_v26 = vpop.permute.xlu0 %398  ;;  %v477_v27 = vpop.permute.xlu2 %476 }
 0x102   :  { %440 = vst.msk [vmem:[#allocation3 + $0x38] sm:$0xff] %vm432_vm7, %v399_v26  ;;  %v1235_v55 = vld [vmem:[#allocation3 + $0x10] sm:$0xff] }
 0x103   :  { %457 = vst.msk [vmem:[#allocation3 + $0x38] sm:$0xff] %vm449_vm8, %v1027_v34  ;;  %567 = vrot.lane.b32.xlu0 %v1235_v55, %s940_s16 }
 0x104   :  { %520 = vst.msk [vmem:[#allocation3 + $0x28] sm:$0xff] %vm514_vm9, %v477_v27 }
 0x105   :  { %v407_v31 = vpop.permute.xlu1 %406 }
 0x106   :  { %444 = vst.msk [vmem:[#allocation3 + $0x58] sm:$0xff] %vm432_vm7, %v407_v31 }
 0x107   :  { %461 = vst.msk [vmem:[#allocation3 + $0x58] sm:$0xff] %vm449_vm8, %v1041_v54 }
 0x109   :  { %v405_v19 = vpop.permute.xlu0 %404  ;;  %v483_v28 = vpop.permute.xlu2 %482 }
 0x10a   :  { %443 = vst.msk [vmem:[#allocation3 + $0x50] sm:$0xff] %vm432_vm7, %v405_v19 }
 0x10b   :  { %460 = vst.msk [vmem:[#allocation3 + $0x50] sm:$0xff] %vm449_vm8, %v1048_v4  ;;  %v1248_v34 = vld [vmem:[#allocation3 + $0x28] sm:$0xff] }
 0x10c   :  { %523 = vst.msk [vmem:[#allocation3 + $0x40] sm:$0xff] %vm514_vm9, %v483_v28  ;;  %573 = vrot.lane.b32.xlu0 %v1248_v34, %s940_s16 }
 0x10d   :  { %v413_v30 = vpop.permute.xlu1 %412 }
 0x10e   :  { %447 = vst.msk [vmem:[#allocation3 + $0x70] sm:$0xff] %vm432_vm7, %v413_v30 }
 0x10f   :  { %464 = vst.msk [vmem:[#allocation3 + $0x70] sm:$0xff] %vm449_vm8, %v1056_v17 }
 0x111   :  { %v411_v54 = vpop.permute.xlu0 %410  ;;  %v489_v32 = vpop.permute.xlu2 %488 }
 0x112   :  { %446 = vst.msk [vmem:[#allocation3 + $0x68] sm:$0xff] %vm432_vm7, %v411_v54 }
 0x113   :  { %463 = vst.msk [vmem:[#allocation3 + $0x68] sm:$0xff] %vm449_vm8, %v1060_v29  ;;  %v1259_v4 = vld [vmem:[#allocation3 + $0x40] sm:$0xff] }
 0x114   :  { %526 = vst.msk [vmem:[#allocation3 + $0x58] sm:$0xff] %vm514_vm9, %v489_v32  ;;  %579 = vrot.lane.b32.xlu0 %v1259_v4, %s940_s16 }
 0x115   :  { %v469_v33 = vpop.permute.xlu1 %468 }
 0x116   :  { %516 = vst.msk [vmem:[#allocation3 + $0x8] sm:$0xff] %vm514_vm9, %v469_v33 }
 0x119   :  { %v467_v35 = vpop.permute.xlu0 %466  ;;  %v495_v36 = vpop.permute.xlu2 %494 }
 0x11a   :  { %515 = vst.msk [vmem:[#allocation3] sm:$0xff] %vm514_vm9, %v467_v35 }
 0x11b   :  { %529 = vst.msk [vmem:[#allocation3 + $0x70] sm:$0xff] %vm514_vm9, %v495_v36  ;;  %v1267_v17 = vld [vmem:[#allocation3 + $0x58] sm:$0xff] }
 0x11c   :  { %585 = vrot.lane.b32.xlu0 %v1267_v17, %s940_s16 }
 0x11d   :  { %v475_v29 = vpop.permute.xlu1 %474  ;;  %v1271_v37 = vld [vmem:[#allocation3 + $0x8] sm:$0xff] }
 0x11e   :  { %519 = vst.msk [vmem:[#allocation3 + $0x20] sm:$0xff] %vm514_vm9, %v475_v29  ;;  %565 = vrot.lane.b32.xlu2 %v1271_v37, %s940_s16 }
 0x121   :  { %v473_v38 = vpop.permute.xlu0 %472  ;;  %v1276_v39 = vld [vmem:[#allocation3] sm:$0xff] }
 0x122   :  { %518 = vst.msk [vmem:[#allocation3 + $0x18] sm:$0xff] %vm514_vm9, %v473_v38  ;;  %563 = vrot.lane.b32.xlu1 %v1276_v39, %s940_s16  ;;  %v1281_v40 = vld [vmem:[#allocation3 + $0x70] sm:$0xff] }
 0x124   :  { %591 = vrot.lane.b32.xlu0 %v1281_v40, %s940_s16 }
 0x125   :  { %v481_v41 = vpop.permute.xlu1 %480  ;;  %v1285_v42 = vld [vmem:[#allocation3 + $0x20] sm:$0xff] }
 0x126   :  { %522 = vst.msk [vmem:[#allocation3 + $0x38] sm:$0xff] %vm514_vm9, %v481_v41  ;;  %571 = vrot.lane.b32.xlu2 %v1285_v42, %s940_s16 }
 0x129   :  { %v479_v43 = vpop.permute.xlu0 %478  ;;  %v1290_v44 = vld [vmem:[#allocation3 + $0x18] sm:$0xff] }
 0x12a   :  { %521 = vst.msk [vmem:[#allocation3 + $0x30] sm:$0xff] %vm514_vm9, %v479_v43  ;;  %569 = vrot.lane.b32.xlu1 %v1290_v44, %s940_s16 }
 0x12c   :  { %629 = vrot.lane.b32.xlu0 %v1271_v37, %s937_s13 }
 0x12d   :  { %v487_v45 = vpop.permute.xlu1 %486  ;;  %v1297_v46 = vld [vmem:[#allocation3 + $0x38] sm:$0xff] }
 0x12e   :  { %525 = vst.msk [vmem:[#allocation3 + $0x50] sm:$0xff] %vm514_vm9, %v487_v45  ;;  %577 = vrot.lane.b32.xlu2 %v1297_v46, %s940_s16 }
 0x131   :  { %v485_v48 = vpop.permute.xlu0 %484  ;;  %v1302_v49 = vld [vmem:[#allocation3 + $0x30] sm:$0xff] }
 0x132   :  { %524 = vst.msk [vmem:[#allocation3 + $0x48] sm:$0xff] %vm514_vm9, %v485_v48  ;;  %575 = vrot.lane.b32.xlu1 %v1302_v49, %s940_s16 }
 0x134   :  { %635 = vrot.lane.b32.xlu0 %v1285_v42, %s937_s13 }
 0x135   :  { %v493_v51 = vpop.permute.xlu1 %492  ;;  %v1309_v52 = vld [vmem:[#allocation3 + $0x50] sm:$0xff] }
 0x136   :  { %528 = vst.msk [vmem:[#allocation3 + $0x68] sm:$0xff] %vm514_vm9, %v493_v51  ;;  %583 = vrot.lane.b32.xlu2 %v1309_v52, %s940_s16 }
 0x139   :  { %v491_v53 = vpop.permute.xlu0 %490  ;;  %v1314_v56 = vld [vmem:[#allocation3 + $0x48] sm:$0xff] }
 0x13a   :  { %527 = vst.msk [vmem:[#allocation3 + $0x60] sm:$0xff] %vm514_vm9, %v491_v53  ;;  %581 = vrot.lane.b32.xlu1 %v1314_v56, %s940_s16 }
 0x13c   :  { %641 = vrot.lane.b32.xlu0 %v1297_v46, %s937_s13 }
 0x13d   :  { %v1321_v57 = vld [vmem:[#allocation3 + $0x68] sm:$0xff] }
 0x13e   :  { %589 = vrot.lane.b32.xlu2 %v1321_v57, %s940_s16 }
 0x141   :  { %v497_v58 = vpop.permute.xlu0 %496  ;;  %v1325_v61 = vld [vmem:[#allocation3 + $0x60] sm:$0xff] }
 0x142   :  { %530 = vst.msk [vmem:[#allocation3 + $0x78] sm:$0xff] %vm514_vm9, %v497_v58  ;;  %587 = vrot.lane.b32.xlu1 %v1325_v61, %s940_s16 }
 0x144   :  { %647 = vrot.lane.b32.xlu0 %v1309_v52, %s937_s13 }
 0x146   :  { %627 = vrot.lane.b32.xlu2 %v1276_v39, %s937_s13 }
 0x149   :  { %v1334_v62 = vld [vmem:[#allocation3 + $0x78] sm:$0xff] }
 0x14a   :  { %593 = vrot.lane.b32.xlu1 %v1334_v62, %s940_s16 }
 0x14c   :  { %653 = vrot.lane.b32.xlu0 %v1321_v57, %s937_s13 }
 0x14e   :  { %633 = vrot.lane.b32.xlu2 %v1290_v44, %s937_s13 }
 0x152   :  { %631 = vrot.lane.b32.xlu1 %v1235_v55, %s937_s13 }
 0x154   :  { %691 = vrot.lane.b32.xlu0 %v1276_v39, %s941_s17 }
 0x156   :  { %639 = vrot.lane.b32.xlu2 %v1302_v49, %s937_s13 }
 0x15a   :  { %637 = vrot.lane.b32.xlu1 %v1248_v34, %s937_s13 }
 0x15c   :  { %697 = vrot.lane.b32.xlu0 %v1290_v44, %s941_s17 }
 0x15e   :  { %645 = vrot.lane.b32.xlu2 %v1314_v56, %s937_s13 }
 0x162   :  { %643 = vrot.lane.b32.xlu1 %v1259_v4, %s937_s13 }
 0x164   :  { %703 = vrot.lane.b32.xlu0 %v1302_v49, %s941_s17 }
 0x166   :  { %651 = vrot.lane.b32.xlu2 %v1325_v61, %s937_s13 }
 0x16a   :  { %649 = vrot.lane.b32.xlu1 %v1267_v17, %s937_s13 }
 0x16c   :  { %709 = vrot.lane.b32.xlu0 %v1314_v56, %s941_s17 }
 0x16e   :  { %657 = vrot.lane.b32.xlu2 %v1334_v62, %s937_s13 }
 0x172   :  { %655 = vrot.lane.b32.xlu1 %v1281_v40, %s937_s13 }
 0x174   :  { %715 = vrot.lane.b32.xlu0 %v1325_v61, %s941_s17 }
 0x175   :  { %v1370_v63 = vpop.permute.xlu0 %567 }
 0x176   :  { %695 = vrot.lane.b32.xlu2 %v1235_v55, %s941_s17 }
 0x178   :  { %v566_v0 = vpop.permute.xlu2 %565 }
 0x179   :  { %v612_v14 = vadd.f32 %v566_v0, %v1271_v37 }
 0x17a   :  { %693 = vrot.lane.b32.xlu1 %v1271_v37, %s941_s17 }
 0x17c   :  { %721 = vrot.lane.b32.xlu0 %v1334_v62, %s941_s17 }
 0x17e   :  { %701 = vrot.lane.b32.xlu2 %v1248_v34, %s941_s17  ;;  %v1380_v1 = vpop.permute.xlu0 %573 }
 0x180   :  { %v572_v2 = vpop.permute.xlu2 %571 }
 0x181   :  { %v615_v59 = vadd.f32 %v572_v2, %v1285_v42 }
 0x182   :  { %699 = vrot.lane.b32.xlu1 %v1285_v42, %s941_s17 }
 0x184   :  { %759 = vrot.lane.b32.xlu0 %v1235_v55, %s942_s18 }
 0x186   :  { %707 = vrot.lane.b32.xlu2 %v1259_v4, %s941_s17  ;;  %v1388_v3 = vpop.permute.xlu0 %579 }
 0x188   :  { %v578_v7 = vpop.permute.xlu2 %577 }
 0x189   :  { %v618_v25 = vadd.f32 %v578_v7, %v1297_v46 }
 0x18a   :  { %705 = vrot.lane.b32.xlu1 %v1297_v46, %s941_s17 }
 0x18c   :  { %765 = vrot.lane.b32.xlu0 %v1248_v34, %s942_s18 }
 0x18e   :  { %713 = vrot.lane.b32.xlu2 %v1267_v17, %s941_s17  ;;  %v1396_v8 = vpop.permute.xlu0 %585 }
 0x190   :  { %v584_v9 = vpop.permute.xlu2 %583 }
 0x191   :  { %v621_v30 = vadd.f32 %v584_v9, %v1309_v52 }
 0x192   :  { %711 = vrot.lane.b32.xlu1 %v1309_v52, %s941_s17 }
 0x194   :  { %v564_v10 = vpop.permute.xlu1 %563  ;;  %771 = vrot.lane.b32.xlu0 %v1259_v4, %s942_s18 }
 0x195   :  { %v611_v16 = vadd.f32 %v564_v10, %v1276_v39 }
 0x196   :  { %719 = vrot.lane.b32.xlu2 %v1281_v40, %s941_s17  ;;  %v1404_v11 = vpop.permute.xlu0 %591 }
 0x198   :  { %v590_v12 = vpop.permute.xlu2 %589 }
 0x19a   :  { %717 = vrot.lane.b32.xlu1 %v1321_v57, %s941_s17 }
 0x19c   :  { %v570_v13 = vpop.permute.xlu1 %569  ;;  %777 = vrot.lane.b32.xlu0 %v1267_v17, %s942_s18 }
 0x19d   :  { %v614_v60 = vadd.f32 %v570_v13, %v1290_v44 }
 0x19e   :  { %757 = vrot.lane.b32.xlu2 %v1271_v37, %s942_s18  ;;  %v630_v15 = vpop.permute.xlu0 %629  ;;  %v624_v37 = vadd.f32 %v590_v12, %v1321_v57 }
 0x19f   :  { %v1414_v18 = vadd.f32 %v630_v15, %v612_v14 }
 0x1a0   :  { %v628_v20 = vpop.permute.xlu2 %627 }
 0x1a1   :  { %v675_v21 = vadd.f32 %v628_v20, %v611_v16 }
 0x1a2   :  { %755 = vrot.lane.b32.xlu1 %v1276_v39, %s942_s18 }
 0x1a4   :  { %v576_v22 = vpop.permute.xlu1 %575  ;;  %783 = vrot.lane.b32.xlu0 %v1281_v40, %s942_s18 }
 0x1a5   :  { %v617_v26 = vadd.f32 %v576_v22, %v1302_v49 }
 0x1a6   :  { %763 = vrot.lane.b32.xlu2 %v1285_v42, %s942_s18  ;;  %v636_v23 = vpop.permute.xlu0 %635 }
 0x1a7   :  { %v1424_v50 = vadd.f32 %v636_v23, %v615_v59  ;;  %v613_v59 = vadd.f32 %v1370_v63, %v1235_v55 }
 0x1a8   :  { %v634_v5 = vpop.permute.xlu2 %633 }
 0x1a9   :  { %v678_v24 = vadd.f32 %v634_v5, %v614_v60 }
 0x1aa   :  { %761 = vrot.lane.b32.xlu1 %v1290_v44, %s942_s18 }
 0x1ac   :  { %v582_v47 = vpop.permute.xlu1 %581 }
 0x1ad   :  { %v620_v32 = vadd.f32 %v582_v47, %v1314_v56 }
 0x1ae   :  { %769 = vrot.lane.b32.xlu2 %v1297_v46, %s942_s18  ;;  %v642_v6 = vpop.permute.xlu0 %641 }
 0x1af   :  { %v1432_v27 = vadd.f32 %v642_v6, %v618_v25 }
 0x1b0   :  { %v640_v31 = vpop.permute.xlu2 %639 }
 0x1b1   :  { %v681_v19 = vadd.f32 %v640_v31, %v617_v26  ;;  %v616_v26 = vadd.f32 %v1380_v1, %v1248_v34 }
 0x1b2   :  { %767 = vrot.lane.b32.xlu1 %v1302_v49, %s942_s18 }
 0x1b4   :  { %v588_v28 = vpop.permute.xlu1 %587 }
 0x1b5   :  { %v623_v39 = vadd.f32 %v588_v28, %v1325_v61 }
 0x1b6   :  { %775 = vrot.lane.b32.xlu2 %v1309_v52, %s942_s18  ;;  %v648_v54 = vpop.permute.xlu0 %647 }
 0x1b7   :  { %v1440_v33 = vadd.f32 %v648_v54, %v621_v30 }
 0x1b8   :  { %v646_v35 = vpop.permute.xlu2 %645 }
 0x1b9   :  { %v684_v36 = vadd.f32 %v646_v35, %v620_v32 }
 0x1ba   :  { %773 = vrot.lane.b32.xlu1 %v1314_v56, %s942_s18 }
 0x1bc   :  { %v594_v29 = vpop.permute.xlu1 %593 }
 0x1bd   :  { %v626_v46 = vadd.f32 %v594_v29, %v1334_v62 }
 0x1be   :  { %781 = vrot.lane.b32.xlu2 %v1321_v57, %s942_s18  ;;  %v654_v38 = vpop.permute.xlu0 %653 }
 0x1bf   :  { %v1448_v41 = vadd.f32 %v654_v38, %v624_v37 }
 0x1c0   :  { %v652_v42 = vpop.permute.xlu2 %651 }
 0x1c1   :  { %v687_v43 = vadd.f32 %v652_v42, %v623_v39 }
 0x1c2   :  { %779 = vrot.lane.b32.xlu1 %v1325_v61, %s942_s18 }
 0x1c4   :  { %v632_v44 = vpop.permute.xlu1 %631 }
 0x1c5   :  { %v677_v23 = vadd.f32 %v632_v44, %v613_v59 }
 0x1c6   :  { %v692_v45 = vpop.permute.xlu0 %691 }
 0x1c7   :  { %v1453_v48 = vadd.f32 %v692_v45, %v675_v21  ;;  %v622_v45 = vadd.f32 %v1396_v8, %v1267_v17 }
 0x1c8   :  { %v658_v49 = vpop.permute.xlu2 %657 }
 0x1c9   :  { %v690_v51 = vadd.f32 %v658_v49, %v626_v46 }
 0x1ca   :  { %785 = vrot.lane.b32.xlu1 %v1334_v62, %s942_s18 }
 0x1cc   :  { %v638_v52 = vpop.permute.xlu1 %637 }
 0x1cd   :  { %v680_v28 = vadd.f32 %v638_v52, %v616_v26 }
 0x1ce   :  { %v698_v53 = vpop.permute.xlu0 %697 }
 0x1cf   :  { %v1457_v56 = vadd.f32 %v698_v53, %v678_v24 }
 0x1d0   :  { %v696_v57 = vpop.permute.xlu2 %695 }
 0x1d1   :  { %v741_v5 = vadd.f32 %v696_v57, %v677_v23 }
 0x1d4   :  { %v644_v58 = vpop.permute.xlu1 %643 }
 0x1d6   :  { %v704_v0 = vpop.permute.xlu0 %703 }
 0x1d7   :  { %v1459_v2 = vadd.f32 %v704_v0, %v681_v19  ;;  %v625_v0 = vadd.f32 %v1404_v11, %v1281_v40 }
 0x1d8   :  { %v702_v61 = vpop.permute.xlu2 %701 }
 0x1d9   :  { %v744_v32 = vadd.f32 %v702_v61, %v680_v28 }
 0x1dc   :  { %v650_v7 = vpop.permute.xlu1 %649 }
 0x1de   :  { %v710_v9 = vpop.permute.xlu0 %709 }
 0x1df   :  { %v1461_v10 = vadd.f32 %v710_v9, %v684_v36  ;;  %v619_v36 = vadd.f32 %v1388_v3, %v1259_v4  ;;  %v686_v3 = vadd.f32 %v650_v7, %v622_v45 }
 0x1e0   :  { %v708_v12 = vpop.permute.xlu2 %707 }
 0x1e1   :  { %v683_v1 = vadd.f32 %v644_v58, %v619_v36 }
 0x1e3   :  { %v747_v39 = vadd.f32 %v708_v12, %v683_v1 }
 0x1e4   :  { %v656_v13 = vpop.permute.xlu1 %655 }
 0x1e5   :  { %v689_v8 = vadd.f32 %v656_v13, %v625_v0 }
 0x1e6   :  { %v716_v14 = vpop.permute.xlu0 %715 }
 0x1e7   :  { %v1463_v15 = vadd.f32 %v716_v14, %v687_v43 }
 0x1e8   :  { %v714_v62 = vpop.permute.xlu2 %713 }
 0x1e9   :  { %v750_v52 = vadd.f32 %v714_v62, %v686_v3 }
 0x1ec   :  { %v694_v16 = vpop.permute.xlu1 %693 }
 0x1ed   :  { %v740_v47 = vadd.f32 %v694_v16, %v1414_v18 }
 0x1ee   :  { %v722_v20 = vpop.permute.xlu0 %721 }
 0x1ef   :  { %v1465_v21 = vadd.f32 %v722_v20, %v690_v51 }
 0x1f0   :  { %v720_v22 = vpop.permute.xlu2 %719 }
 0x1f1   :  { %v753_v12 = vadd.f32 %v720_v22, %v689_v8 }
 0x1f4   :  { %v700_v60 = vpop.permute.xlu1 %699 }
 0x1f5   :  { %v743_v63 = vadd.f32 %v700_v60, %v1424_v50 }
 0x1f6   :  { %v760_v24 = vpop.permute.xlu0 %759 }
 0x1f7   :  { %v805_v25 = vadd.f32 %v760_v24, %v741_v5 }
 0x1f8   :  { %v758_v6 = vpop.permute.xlu2 %757 }
 0x1f9   :  { %v804_v31 = vadd.f32 %v758_v6, %v740_v47  ;;  %v821_v19 = vmul.f32 0.04, %v805_v25 }
 0x1fb   :  { %v820_v30 = vmul.f32 0.04, %v804_v31  ;;  %837 = vst.msk [vmem:[#allocation7 + $0x10] sm:$0xff] %vm41_vm0, %v821_v19 }
 0x1fc   :  { %v706_v54 = vpop.permute.xlu1 %705 }
 0x1fd   :  { %836 = vst.msk [vmem:[#allocation7 + $0x8] sm:$0xff] %vm41_vm0, %v820_v30  ;;  %v746_v43 = vadd.f32 %v706_v54, %v1432_v27 }
 0x1fe   :  { %v766_v55 = vpop.permute.xlu0 %765 }
 0x1ff   :  { %v808_v35 = vadd.f32 %v766_v55, %v744_v32 }
 0x200   :  { %v764_v18 = vpop.permute.xlu2 %763 }
 0x201   :  { %v807_v29 = vadd.f32 %v764_v18, %v743_v63  ;;  %v824_v34 = vmul.f32 0.04, %v808_v35 }
 0x203   :  { %v823_v37 = vmul.f32 0.04, %v807_v29  ;;  %840 = vst.msk [vmem:[#allocation7 + $0x28] sm:$0xff] %vm41_vm0, %v824_v34 }
 0x204   :  { %v712_v38 = vpop.permute.xlu1 %711 }
 0x205   :  { %839 = vst.msk [vmem:[#allocation7 + $0x20] sm:$0xff] %vm41_vm0, %v823_v37  ;;  %v749_v57 = vadd.f32 %v712_v38, %v1440_v33 }
 0x206   :  { %v772_v42 = vpop.permute.xlu0 %771 }
 0x207   :  { %v811_v44 = vadd.f32 %v772_v42, %v747_v39 }
 0x208   :  { %v770_v50 = vpop.permute.xlu2 %769 }
 0x209   :  { %v810_v46 = vadd.f32 %v770_v50, %v746_v43  ;;  %v827_v4 = vmul.f32 0.04, %v811_v44 }
 0x20b   :  { %v826_v49 = vmul.f32 0.04, %v810_v46  ;;  %843 = vst.msk [vmem:[#allocation7 + $0x40] sm:$0xff] %vm41_vm0, %v827_v4 }
 0x20c   :  { %v718_v51 = vpop.permute.xlu1 %717 }
 0x20d   :  { %842 = vst.msk [vmem:[#allocation7 + $0x38] sm:$0xff] %vm41_vm0, %v826_v49  ;;  %v752_v33 = vadd.f32 %v718_v51, %v1448_v41 }
 0x20e   :  { %v778_v53 = vpop.permute.xlu0 %777 }
 0x20f   :  { %v814_v58 = vadd.f32 %v778_v53, %v750_v52 }
 0x210   :  { %v776_v27 = vpop.permute.xlu2 %775 }
 0x211   :  { %v813_v61 = vadd.f32 %v776_v27, %v749_v57  ;;  %v830_v17 = vmul.f32 0.04, %v814_v58 }
 0x213   :  { %v829_v9 = vmul.f32 0.04, %v813_v61  ;;  %846 = vst.msk [vmem:[#allocation7 + $0x58] sm:$0xff] %vm41_vm0, %v830_v17 }
 0x214   :  { %v756_v7 = vpop.permute.xlu1 %755 }
 0x215   :  { %845 = vst.msk [vmem:[#allocation7 + $0x50] sm:$0xff] %vm41_vm0, %v829_v9  ;;  %v803_v14 = vadd.f32 %v756_v7, %v1453_v48 }
 0x216   :  { %v784_v62 = vpop.permute.xlu0 %783 }
 0x217   :  { %v819_v16 = vmul.f32 0.04, %v803_v14  ;;  %v817_v20 = vadd.f32 %v784_v62, %v753_v12 }
 0x218   :  { %v782_v59 = vpop.permute.xlu2 %781 }
 0x219   :  { %835 = vst.msk [vmem:[#allocation7] sm:$0xff] %vm41_vm0, %v819_v16  ;;  %v816_v40 = vadd.f32 %v782_v59, %v752_v33  ;;  %v833_v11 = vmul.f32 0.04, %v817_v20 }
 0x21b   :  { %v832_v13 = vmul.f32 0.04, %v816_v40  ;;  %849 = vst.msk [vmem:[#allocation7 + $0x70] sm:$0xff] %vm41_vm0, %v833_v11 }
 0x21c   :  { %v762_v23 = vpop.permute.xlu1 %761 }
 0x21d   :  { %848 = vst.msk [vmem:[#allocation7 + $0x68] sm:$0xff] %vm41_vm0, %v832_v13  ;;  %v806_v22 = vadd.f32 %v762_v23, %v1457_v56 }
 0x21f   :  { %v822_v60 = vmul.f32 0.04, %v806_v22 }
 0x221   :  { %838 = vst.msk [vmem:[#allocation7 + $0x18] sm:$0xff] %vm41_vm0, %v822_v60 }
 0x224   :  { %v768_v48 = vpop.permute.xlu1 %767 }
 0x225   :  { %v809_v41 = vadd.f32 %v768_v48, %v1459_v2 }
 0x227   :  { %v825_v5 = vmul.f32 0.04, %v809_v41 }
 0x229   :  { %841 = vst.msk [vmem:[#allocation7 + $0x30] sm:$0xff] %vm41_vm0, %v825_v5 }
 0x22c   :  { %v774_v24 = vpop.permute.xlu1 %773 }
 0x22d   :  { %v812_v47 = vadd.f32 %v774_v24, %v1461_v10 }
 0x22f   :  { %v828_v25 = vmul.f32 0.04, %v812_v47 }
 0x231   :  { %844 = vst.msk [vmem:[#allocation7 + $0x48] sm:$0xff] %vm41_vm0, %v828_v25 }
 0x234   :  { %v780_v6 = vpop.permute.xlu1 %779 }
 0x235   :  { %v815_v26 = vadd.f32 %v780_v6, %v1463_v15 }
 0x237   :  { %v831_v31 = vmul.f32 0.04, %v815_v26 }
 0x239   :  { %847 = vst.msk [vmem:[#allocation7 + $0x60] sm:$0xff] %vm41_vm0, %v831_v31 }
 0x23c   :  { %v786_v56 = vpop.permute.xlu1 %785 }
 0x23d   :  { %v818_v2 = vadd.f32 %v786_v56, %v1465_v21 }
 0x23f   :  { %v834_v19 = vmul.f32 0.04, %v818_v2 }
 0x241   :  { %850 = vst.msk [vmem:[#allocation7 + $0x78] sm:$0xff] %vm41_vm0, %v834_v19 }
 0x242   :  { %863 = dma.vmem_to_hbm [thread:$0]  %s856_s20, 2048, %s858_s23, [#allocation6], %s934_s11, %s934_s11, %s935_s12  }
 0x243   :  { %931 = dma.done.wait [#allocation6], 2048  }
 0x244   :  { %932 = vsyncadd [#allocation6], 4294965248 }
 0x245   :  { %868 = vsyncpa [#allocation5], 1 }
 0x246   :  { %869 = vsyncpa [#allocation6], 1 }

</bundles_post_ra>
